<compile_context>
chip_gen: v5e
topology: v5e:2x2
jax: 0.10.0
libtpu: 0.0.40
codegen_flags: <defaults>
</compile_context>

<pallas_src>
import functools

import jax
import jax.numpy as jnp
from jax.experimental import pallas as pl
from jax.experimental.pallas import tpu as pltpu

_LANES = 128      # vreg lane count (last dim of the lane-dense view)
_SUBLANES = 8     # vreg sublane count
_MAX_TM = 2048    # max rows per block: 2048*128*4B = 1 MiB per operand per block
_NCORES = 2       # leading 'parallel' grid axis (uses both v7x TensorCores)


def _round_up(x, m):
    return ((x + m - 1) // m) * m


def _ddp_l1_sum_kernel(denom_ref, inp_ref, tgt_ref, out_ref, acc_ref, *, max_f):
    """Accumulate per-core partial sums of |nan_to_num(input) - target|.

    acc_ref: (8, 128) f32 lane-dense accumulator (scratch, persists across the
    sequential grid axis).  The cross-lane reduction is deferred to the caller.
    """

    @pl.when(pl.program_id(1) == 0)
    def _init():
        acc_ref[...] = jnp.zeros_like(acc_ref)

    x = inp_ref[...]
    # torch.nan_to_num(input) defaults: nan -> 0, +/-inf -> +/-finfo(dtype).max
    # (finfo of the *input* dtype, applied before any upcast).
    x = jnp.where(jnp.isnan(x), jnp.zeros_like(x), x)
    x = jnp.clip(x, -max_f, max_f)

    diff = jnp.abs(x.astype(jnp.float32) - tgt_ref[...].astype(jnp.float32))
    tm = diff.shape[0]
    # Sublane-group reduction only: (tm,128) -> (tm//8, 8, 128) -> sum(axis=0).
    # This is a chain of whole-vreg adds on the VPU; no XLU work in the loop.
    acc_ref[...] += jnp.sum(
        diff.reshape(tm // _SUBLANES, _SUBLANES, _LANES), axis=0
    )

    @pl.when(pl.program_id(1) == pl.num_programs(1) - 1)
    def _finalize():
        denom_f = denom_ref[0].astype(jnp.float32)
        out_ref[...] = (acc_ref[...] / denom_f).reshape(1, _SUBLANES, _LANES)


def _l1_sum_pallas(inp, tgt, denom):
    """sum(|nan_to_num(inp) - tgt|) / denom over all elements of inp/tgt."""
    assert inp.shape == tgt.shape, (inp.shape, tgt.shape)
    total_elems = int(inp.size)
    max_f = float(jnp.finfo(inp.dtype).max)

    # ---- lane-dense view: flatten, zero-pad, reshape to (padded_rows, 128) ----
    rows = _round_up(max(total_elems, 1), _LANES) // _LANES        # cdiv
    per_core_rows = _round_up(rows, _NCORES) // _NCORES            # cdiv
    steps = _round_up(per_core_rows, _MAX_TM) // _MAX_TM           # cdiv, >= 1
    tm = _round_up(-(-per_core_rows // steps), _SUBLANES)          # rows per block
    padded_rows = tm * steps * _NCORES
    padded_elems = padded_rows * _LANES

    flat_in = inp.reshape(-1)
    flat_tg = tgt.reshape(-1)
    pad = padded_elems - total_elems
    if pad:
        # Zero-pad both operands: padded positions contribute |0 - 0| = 0.
        flat_in = jnp.pad(flat_in, (0, pad))
        flat_tg = jnp.pad(flat_tg, (0, pad))
    x2 = flat_in.reshape(padded_rows, _LANES)
    t2 = flat_tg.reshape(padded_rows, _LANES)

    kernel = functools.partial(_ddp_l1_sum_kernel, max_f=max_f)

    partials = pl.pallas_call(
        kernel,
        out_shape=jax.ShapeDtypeStruct((_NCORES, _SUBLANES, _LANES), jnp.float32),
        grid_spec=pltpu.PrefetchScalarGridSpec(
            num_scalar_prefetch=1,          # denom (int32) lands in SMEM
            grid=(_NCORES, steps),
            in_specs=[
                pl.BlockSpec((tm, _LANES), lambda c, i, d: (c * steps + i, 0)),
                pl.BlockSpec((tm, _LANES), lambda c, i, d: (c * steps + i, 0)),
            ],
            out_specs=pl.BlockSpec(
                (1, _SUBLANES, _LANES), lambda c, i, d: (c, 0, 0)
            ),
            scratch_shapes=[pltpu.VMEM((_SUBLANES, _LANES), jnp.float32)],
        ),
        compiler_params=pltpu.CompilerParams(
            dimension_semantics=("parallel", "arbitrary"),
        ),
    )(jnp.asarray([denom], jnp.int32), x2, t2)

    # Single tiny cross-lane combine of the (ncores, 8, 128) partials.
    return jnp.sum(partials)


class DDPLossPallas:
    """JAX/Pallas equivalent of ocpmodels DDPLoss wrapping an L1Loss."""

    def __init__(self, reduction="mean"):
        assert reduction in ["mean", "sum"]
        self.reduction = reduction
        # Single-process setting: distutils.get_world_size() == 1 and
        # all_reduce(num_samples) == num_samples.
        self.world_size = 1

    def __call__(self, input, target, natoms=None, batch_size=None):
        # TODO(synk): natoms-weighted loss_fn variants (per-atom force losses)
        # are not implemented; plain L1 'sum' loss over all elements is used.
        if self.reduction == "mean":
            num_samples = (
                int(batch_size) if batch_size is not None else int(input.shape[0])
            )
            denom = num_samples // self.world_size if False else num_samples
            # loss * world_size / num_samples with world_size == 1
            return _l1_sum_pallas(input, target, denom) * self.world_size
        return _l1_sum_pallas(input, target, 1)


def _reference(input, target, reduction="mean", batch_size=None):
    max_f = jnp.finfo(input.dtype).max
    x = jnp.where(jnp.isnan(input), jnp.zeros_like(input), input)
    x = jnp.clip(x, -max_f, max_f)
    loss = jnp.sum(jnp.abs(x.astype(jnp.float32) - target.astype(jnp.float32)))
    if reduction == "mean":
        n = batch_size if batch_size is not None else input.shape[0]
        return loss / jnp.float32(n)
    return loss


if __name__ == "__main__":
    key = jax.random.PRNGKey(0)
    k1, k2, k3, k4 = jax.random.split(key, 4)

    # Case 1: (N, 128) predictions, 'mean' reduction, nan + inf injected.
    N, D = 16, 128
    inp = jax.random.normal(k1, (N, D), dtype=jnp.float32)
    tgt = jax.random.normal(k2, (N, D), dtype=jnp.float32)
    inp = inp.at[3, 7].set(jnp.nan)
    inp = inp.at[10, 100].set(jnp.inf)

    loss_mean = DDPLossPallas(reduction="mean")
    out = jax.block_until_ready(loss_mean(inp, tgt))
    ref = _reference(inp, tgt, reduction="mean")
    assert jnp.allclose(out, ref, rtol=1e-5), (out, ref)

    # Case 2: force-like (N, 3) predictions (lane-sparse originally), 'sum'
    # reduction; exercises the lane-dense flatten + zero-pad path.
    Nf = 50
    inp_f = jax.random.normal(k3, (Nf, 3), dtype=jnp.float32)
    tgt_f = jax.random.normal(k4, (Nf, 3), dtype=jnp.float32)
    loss_sum = DDPLossPallas(reduction="sum")
    out2 = jax.block_until_ready(loss_sum(inp_f, tgt_f))
    ref2 = _reference(inp_f, tgt_f, reduction="sum")
    assert jnp.allclose(out2, ref2, rtol=1e-5), (out2, ref2)

    # Case 3: 'mean' with explicit batch_size (fused normalization path).
    out3 = jax.block_until_ready(loss_mean(inp_f, tgt_f, batch_size=5))
    ref3 = _reference(inp_f, tgt_f, reduction="mean", batch_size=5)
    assert jnp.allclose(out3, ref3, rtol=1e-5), (out3, ref3)

    print("KERNEL_OK")
</pallas_src>

<mosaic_0001>
module attributes {stable_mosaic.version = 11 : i64} {
  func.func @_ddp_l1_sum_kernel(%arg0: i32, %arg1: i32, %arg2: memref<1xi32, #tpu.memory_space<smem>>, %arg3: memref<8x128xf32, #tpu.memory_space<vmem>>, %arg4: memref<8x128xf32, #tpu.memory_space<vmem>>, %arg5: memref<1x8x128xf32, #tpu.memory_space<vmem>>, %arg6: memref<8x128xf32, #tpu.memory_space<vmem>>) attributes {dimension_semantics = [#tpu.dimension_semantics<parallel>, #tpu.dimension_semantics<arbitrary>], iteration_bounds = array<i64: 2, 1>, scalar_prefetch = 1 : i64, scratch_operands = 1 : i64, tpu.core_type = #tpu.core_type<tc>, window_params = [{transform_indices = @transform_0, window_bounds = array<i64: 8, 128>}, {transform_indices = @transform_1, window_bounds = array<i64: 8, 128>}, {transform_indices = @transform_2, window_bounds = array<i64: 1, 8, 128>}]} {
    %c0_i32 = arith.constant 0 : i32
    %0 = arith.cmpi eq, %arg1, %c0_i32 : i32
    %1 = arith.extui %0 : i1 to i32
    %c0_i32_0 = arith.constant 0 : i32
    %2 = arith.cmpi ne, %1, %c0_i32_0 : i32
    scf.if %2 {
      %cst_13 = arith.constant 0.000000e+00 : f32
      %22 = vector.broadcast %cst_13 : f32 to vector<8x128xf32>
      %c0_14 = arith.constant 0 : index
      %c0_15 = arith.constant 0 : index
      %23 = vector.load %arg6[%c0_14, %c0_15] : memref<8x128xf32, #tpu.memory_space<vmem>>, vector<8x128xf32>
      tpu.vector_store %arg6[%c0_14, %c0_15], %22 {strides = array<i32>} : memref<8x128xf32, #tpu.memory_space<vmem>>, vector<8x128xf32>,
    } else {
    }
    %c0 = arith.constant 0 : index
    %c0_1 = arith.constant 0 : index
    %3 = vector.load %arg3[%c0, %c0_1] : memref<8x128xf32, #tpu.memory_space<vmem>>, vector<8x128xf32>
    %4 = arith.cmpf one, %3, %3 : vector<8x128xf32>
    %cst = arith.constant 0.000000e+00 : f32
    %5 = vector.broadcast %cst : f32 to vector<8x128xf32>
    %6 = arith.select %4, %5, %3 : vector<8x128xi1>, vector<8x128xf32>
    %cst_2 = arith.constant -3.40282347E+38 : f32
    %cst_3 = arith.constant 3.40282347E+38 : f32
    %7 = vector.broadcast %cst_2 : f32 to vector<8x128xf32>
    %8 = arith.maximumf %7, %6 : vector<8x128xf32>
    %9 = vector.broadcast %cst_3 : f32 to vector<8x128xf32>
    %10 = arith.minimumf %9, %8 : vector<8x128xf32>
    %c0_4 = arith.constant 0 : index
    %c0_5 = arith.constant 0 : index
    %11 = vector.load %arg4[%c0_4, %c0_5] : memref<8x128xf32, #tpu.memory_space<vmem>>, vector<8x128xf32>
    %12 = arith.subf %10, %11 : vector<8x128xf32>
    %13 = math.absf %12 : vector<8x128xf32>
    %c0_6 = arith.constant 0 : index
    %c0_7 = arith.constant 0 : index
    %14 = vector.load %arg6[%c0_6, %c0_7] : memref<8x128xf32, #tpu.memory_space<vmem>>, vector<8x128xf32>
    %15 = vector.shape_cast %13 : vector<8x128xf32> to vector<1x8x128xf32>
    %cst_8 = arith.constant dense<0.000000e+00> : vector<8x128xf32>
    %16 = vector.multi_reduction <add>, %15, %cst_8 [0] : vector<1x8x128xf32> to vector<8x128xf32>
    %17 = arith.addf %14, %16 : vector<8x128xf32>
    %c0_9 = arith.constant 0 : index
    %c0_10 = arith.constant 0 : index
    %18 = vector.load %arg6[%c0_9, %c0_10] : memref<8x128xf32, #tpu.memory_space<vmem>>, vector<8x128xf32>
    tpu.vector_store %arg6[%c0_9, %c0_10], %17 {strides = array<i32>} : memref<8x128xf32, #tpu.memory_space<vmem>>, vector<8x128xf32>,
    %c0_i32_11 = arith.constant 0 : i32
    %19 = arith.cmpi eq, %arg1, %c0_i32_11 : i32
    %20 = arith.extui %19 : i1 to i32
    %c0_i32_12 = arith.constant 0 : i32
    %21 = arith.cmpi ne, %20, %c0_i32_12 : i32
    scf.if %21 {
      %c0_13 = arith.constant 0 : index
      %22 = memref.load %arg2[%c0_13] : memref<1xi32, #tpu.memory_space<smem>>
      %23 = arith.sitofp %22 : i32 to f32
      %c0_14 = arith.constant 0 : index
      %c0_15 = arith.constant 0 : index
      %24 = vector.load %arg6[%c0_14, %c0_15] : memref<8x128xf32, #tpu.memory_space<vmem>>, vector<8x128xf32>
      %25 = vector.broadcast %23 : f32 to vector<8x128xf32>
      %26 = arith.divf %24, %25 : vector<8x128xf32>
      %27 = vector.shape_cast %26 : vector<8x128xf32> to vector<1x8x128xf32>
      %c0_16 = arith.constant 0 : index
      %c0_17 = arith.constant 0 : index
      %c0_18 = arith.constant 0 : index
      %28 = vector.load %arg5[%c0_16, %c0_17, %c0_18] : memref<1x8x128xf32, #tpu.memory_space<vmem>>, vector<1x8x128xf32>
      tpu.vector_store %arg5[%c0_16, %c0_17, %c0_18], %27 {strides = array<i32>} : memref<1x8x128xf32, #tpu.memory_space<vmem>>, vector<1x8x128xf32>,
    } else {
    }
    return
  }
  func.func @transform_0(%arg0: i32, %arg1: i32, %arg2: memref<1xi32, #tpu.memory_space<smem>>) -> (i32, i32) {
    %c1_i32 = arith.constant 1 : i32
    %0 = arith.muli %arg0, %c1_i32 : i32
    %1 = arith.addi %0, %arg1 : i32
    %c0_i32 = arith.constant 0 : i32
    %c0_i32_0 = arith.constant 0 : i32
    return %1, %c0_i32 : i32, i32
  }
  func.func @transform_1(%arg0: i32, %arg1: i32, %arg2: memref<1xi32, #tpu.memory_space<smem>>) -> (i32, i32) {
    %c1_i32 = arith.constant 1 : i32
    %0 = arith.muli %arg0, %c1_i32 : i32
    %1 = arith.addi %0, %arg1 : i32
    %c0_i32 = arith.constant 0 : i32
    %c0_i32_0 = arith.constant 0 : i32
    return %1, %c0_i32 : i32, i32
  }
  func.func @transform_2(%arg0: i32, %arg1: i32, %arg2: memref<1xi32, #tpu.memory_space<smem>>) -> (i32, i32, i32) {
    %c0_i32 = arith.constant 0 : i32
    %c0_i32_0 = arith.constant 0 : i32
    %c0_i32_1 = arith.constant 0 : i32
    return %arg0, %c0_i32, %c0_i32_0 : i32, i32, i32
  }
}

</mosaic_0001>

<bundles_post_ra>
// kernel: tpu_custom_call.1
= control target key start
LH: loop header
LB: loop body
LE: loop exit
PB: predicated region body
PF: predicated region fallthrough
CT: control target
= control target key end

     0   :  { %s771_s0 = inlined_call_operand.<no memory space> [shape: s32[1], index: 0, kind: input, shape index: {}]   ;;  %s772_s1 = inlined_call_operand.hbm [shape: f32[16,128], index: 1, kind: input, shape index: {}]   ;;  %s773_s2 = inlined_call_operand.hbm [shape: f32[16,128], index: 2, kind: input, shape index: {}]   ;;  %s774_s3 = inlined_call_operand.hbm [shape: f32[2,8,128], index: 3, kind: output, shape index: {}]  }
   0x1   :  { %8 = sst [smem:[#allocation4]] %s771_s0 }
   0x2   :  { %9 = vsyncpa [#allocation6], 0 }
   0x3   :  { %11 = vsyncpa [#allocation6 + $0x1], 0 }
   0x4   :  { %12 = vsyncpa [#allocation9], 0 }
   0x5   :  { %14 = vsyncpa [#allocation9 + $0x1], 0 }
   0x6   :  { %15 = vsyncpa [#allocation7], 0 }
   0x7   :  { %17 = vsyncpa [#allocation7 + $0x1], 0  ;;  %s638_s14 = smov 0   ;;  %s640_s15 = smov 0  }
   0x8   :  { %s642_s16 = smov 0   ;;  %s644_s17 = smov 0  }
   0x9   :  { %s646_s18 = smov 0   ;;  %s648_s19 = smov 0  }
   0xa LB: > { %s381_s0 = sadd.s32 4294967295, %s613_s19   ;;  %s382_s20 = sadd.s32 4294967294, %s613_s19   ;;  %s613_s19 = sphi %s648_s19, %s23_s19   ;;  %s609_s18 = sphi %s646_s18, %s783_s18   ;;  %s605_s17 = sphi %s644_s17, %s782_s17   ;;  %s601_s16 = sphi %s642_s16, %s781_s16   ;;  %s597_s15 = sphi %s640_s15, %s780_s15   ;;  %s593_s14 = sphi %s638_s14, %s779_s14  }
   0xb   : > { %s35_s21 = sadd.s32 1, %s609_s18  ;;  %s44_s22 = sadd.s32 1, %s601_s16 }
   0xc   : > { %p37_p0 = scmp.ge.s32.totalorder %s35_s21, 2  ;;  %p51_p1 = scmp.ne.s32.totalorder %s601_s16, %s597_s15 }
   0xd   : > { %p52_p2 = scmp.eq.s32.totalorder %s613_s19, 0  ;;  %p57_p3 = scmp.ne.s32.totalorder %s597_s15, %s593_s14 }
   0xe   : > { %s785_s21 = smov (%p37_p0, %s35_s21), 0  ;;  %p58_p5 = scmp.eq.s32.totalorder %s381_s0, 0 }
   0xf   : > { %p679_p4 = por %p52_p2, %p51_p1  ;;  %s41_s24 = ssub.s32 %s609_s18, %s785_s21 }
  0x10   : > { %p109_p6 = scmp.eq.s32.totalorder %s381_s0, 1  ;;  %p42_p7 = scmp.eq.s32.totalorder %s41_s24, 0 }
  0x11   : > { %p685_p8 = por %p58_p5, %p57_p3  ;;  %p115_p10 = scmp.eq.s32.totalorder %s382_s20, 1 }
  0x12   : > { %p689_p9 = por %p109_p6, %p51_p1  ;;  %p384_p12 = scmp.ge.s32.totalorder %s613_s19, 2 }
  0x13   : > { %s694_s27 = scalar_select %p42_p7, %s601_s16, %s44_s22  }
  0x14   : > { %p696_p11 = por %p115_p10, %p57_p3  ;;  %p415_p13 = scmp.lt.s32.totalorder %s613_s19, 2 }
  0x15   : > { %s135_s29 = sand.u32 1, %s601_s16   ;;  %s386_s4 = sshll.u32 %s609_s18, 3 }
  0x16   : > { %s385_s30 = sshll.u32 %s135_s29, 3  ;;  %s144_s7 = scalar_lea.hbm %s772_s1, %s386_s4 }
  0x17   : > { %s139_s8 = scalar_lea.vmem [#allocation5], %s385_s30  ;;  %s146_s10 = sshll.u32 %s144_s7, 4  ;;  %s147_s10 = int_to_ptr.hbm [resolvable:$true] %s146_s10 }
  0x18   : > { %s148_s9 = sshll.u32 %s139_s8, 4  ;;  %p405_p0 = pnand %p415_p13, %p679_p4  ;;  %s149_s9 = int_to_ptr.vmem [resolvable:$true] %s148_s9 }
  0x19   : > { %p389_p1 = scmp.ge.s32.totalorder %s613_s19, 1  ;;  %p173_p2 = scmp.lt.s32.totalorder %s613_s19, 3 }
  0x1a   : > { %s136_s11 = scalar_lea.sflag [#allocation6], %s135_s29  ;;  %s164_s0 = scalar_lea.hbm %s773_s2, %s386_s4 }
  0x1b   : > { %407 = dma.hbm_to_vmem [thread:$0]  (!%p405_p0), %s147_s10, 128, %s149_s9, %s136_s11  }
  0x1c   : > { %p174_p3 = pnand %p389_p1, %p173_p2  ;;  %s159_s20 = scalar_lea.vmem [#allocation8], %s385_s30 }
  0x1d   : > { %s168_s22 = sshll.u32 %s159_s20, 4  ;;  %s166_s24 = sshll.u32 %s164_s0, 4  ;;  %s169_s22 = int_to_ptr.vmem [resolvable:$true] %s168_s22  ;;  %s167_s24 = int_to_ptr.hbm [resolvable:$true] %s166_s24 }
  0x1e   : > { %s156_s5 = scalar_lea.sflag [#allocation9], %s135_s29  ;;  %177 = sbr.rel (%p174_p3) target bundleno = 69 (0x45), region = 28 }
  0x1f   : > { %410 = dma.hbm_to_vmem [thread:$0]  (!%p405_p0), %s167_s24, 128, %s169_s22, %s156_s5  }
  0x20   : > { %s715_s23 = sand.u32 (!%p174_p3), 1, %s597_s15  }
  0x21   : > { %s718_s6 = sshll.u32 (!%p174_p3), %s715_s23, 3  ;;  %s180_s7 = scalar_lea.sflag (!%p174_p3), [#allocation6], %s715_s23 }
  0x22   : > { %s183_s8 = scalar_lea.vmem (!%p174_p3), [#allocation5], %s718_s6 }
  0x23   : > { %580 = dma.done.wait (%p685_p8), %s180_s7, 128  }
  0x24   : > { %582 = vsyncadd (%p685_p8), %s180_s7, 4294967168  ;;  %s190_s29 = scalar_lea.sflag [#allocation9], %s715_s23  ;;  %s193_s30 = scalar_lea.vmem [#allocation8], %s718_s6 }
  0x25   : > { %584 = dma.done.wait (%p685_p8), %s190_s29, 128  }
  0x26   : > { %586 = vsyncadd (%p685_p8), %s190_s29, 4294967168  ;;  %s242_s4 = sld [smem:[#allocation4]]  ;;  %v227_v0 = vld [vmem:[%s183_s8] sm:$0xff]  ;;  %v232_v5 = vld [vmem:[%s193_s30] sm:$0xff]  ;;  %s395_s10 = sshll.u32 %s605_s17, 3 }
  0x27   : > { %vm228_vm0 = vcmp.ne.f32.partialorder %v227_v0, %v227_v0  ;;  %s273_s12 = scalar_lea.hbm %s774_s3, %s395_s10  ;;  %s219_s13 = scalar_lea.vmem [#allocation10], %s718_s6 }
  0x28   : > { %v229_v2 = vsel %vm228_vm0, 0.0, %v227_v0  ;;  %s275_s0 = sshll.u32 %s219_s13, 4  ;;  %s277_s20 = sshll.u32 %s273_s12, 4  ;;  %s276_s0 = int_to_ptr.vmem [resolvable:$true] %s275_s0  ;;  %s278_s20 = int_to_ptr.hbm [resolvable:$true] %s277_s20 }
  0x29   : > { %v393_v3 = vclamps-f32 %v229_v2, 3.4028235e+38  ;;  %s263_s17 = scalar_lea.sflag [#allocation7], %s715_s23  ;;  %s541_s22 = sshra.s32 %s278_s20, 4  ;;  %s542_s22 = int_to_ptr.hbm [resolvable:$true] %s541_s22 }
  0x2a   : > { %s543_s24 = scalar_lea.hbm %s542_s22, 8  ;;  %s547_s6 = scalar_lea.hbm %s774_s3, 16 }
  0x2b   : > { %v233_v9 = vsub.f32 %v393_v3, %v232_v5  ;;  %p544_p4 = scmp.ne.s32.totalorder %s542_s22, %s543_s24  ;;  %p548_p7 = scmp.lt.s32.totalorder %s542_s22, %s774_s3 }
  0x2c   : > { %s243_s9 = scvt.s32.f32 %s242_s4  ;;  %p549_p8 = scmp.lt.s32.totalorder %s547_s6, %s543_s24 }
  0x2d   : > { %v234_v13 = vand.u32 2147483647, %v233_v9  ;;  %p545_p5 = pnand %p544_p4, %p689_p9 }
  0x2e   : > { %v245_v1 = vstv %s243_s9  ;;  %p550_p10 = por %p549_p8, %p548_p7 }
  0x2f   : > { %465 = vrcp.f32 %v245_v1  ;;  %vm251_vm1 = vweird.f32 %v245_v1  ;;  %v257_v7 = vand.u32 2147483648, %v245_v1  ;;  %v255_v10 = vand.u32 2147483647, %v245_v1  ;;  %p546_p6 = pneg %p545_p5 }
  0x31   : > { %v258_v12 = vor.u32 1.1754944e-38, %v257_v7  ;;  %vm256_vm4 = vcmp.eq.f32.partialorder %v255_v10, 8.507059e+37  ;;  %p551_p13 = pnand %p550_p10, %p546_p6 }
  0x35   : > { %v466_v4 = vpop.eup %465 }
  0x36   : > { %v247_v6 = vmul.f32 %v466_v4, %v245_v1  ;;  %vm252_vm2 = vweird.f32 %v466_v4 }
  0x37   : > { %vm253_vm3 = vmor %vm251_vm1, %vm252_vm2 }
  0x38   : > { %v248_v8 = vsub.f32 1.0, %v247_v6 }
  0x3a   : > { %v249_v11 = vmul.f32 %v466_v4, %v248_v8 }
  0x3c   : > { %v250_v14 = vadd.f32 %v466_v4, %v249_v11 }
  0x3e   : > { %v254_v15 = vsel %vm253_vm3, %v466_v4, %v250_v14 }
  0x3f   : > { %v259_v16 = vsel %vm256_vm4, %v258_v12, %v254_v15 }
  0x40   : > { %v260_v17 = vmul.f32 %v259_v16, %v234_v13 }
  0x42   : > { %261 = vst [vmem:[%s219_s13] sm:$0xff] %v260_v17 }
  0x43   : > { %554 = shalt.err (!%p551_p13)
}
  0x44   : > { %402 = dma.vmem_to_hbm [thread:$0]  (%p689_p9), %s276_s0, 128, %s278_s20, %s263_s17  }
  0x45 PF: > { %s289_s23 = sand.u32 1, %s593_s14   ;;  %p412_p0 = pnand %p384_p12, %p696_p11 }
  0x46   : > { %s290_s30 = scalar_lea.sflag [#allocation7], %s289_s23 }
  0x47   : > { %p413_p1 = pneg %p412_p0 }
  0x49   : > { %588 = dma.done.wait (%p413_p1), %s290_s30, 128  }
  0x4a   : > { %590 = vsyncadd (%p413_p1), %s290_s30, 4294967168  ;;  %s23_s19 = sadd.s32 1, %s613_s19   ;;  %s779_s14 = smov %s597_s15 }
  0x4b   : > { %p20_p2 = scmp.ge.s32.totalorder %s23_s19, 4   ;;  %s780_s15 = smov %s601_s16 }
  0x4c   : > { %s781_s16 = smov %s694_s27  ;;  %s782_s17 = smov %s609_s18 }
  0x4d   : > { %s783_s18 = smov %s785_s21  ;;  %22 = sbr.rel (!%p20_p2) target bundleno = 10 (0xa), region = 94 }
  0x52   :  { %296 = vsyncpa [#allocation6], 1 }
  0x53   :  { %298 = vsyncpa [#allocation6 + $0x1], 1 }
  0x54   :  { %299 = vsyncpa [#allocation9], 1 }
  0x55   :  { %301 = vsyncpa [#allocation9 + $0x1], 1 }
  0x56   :  { %302 = vsyncpa [#allocation7], 1 }
  0x57   :  { %304 = vsyncpa [#allocation7 + $0x1], 1 }

</bundles_post_ra>
